<compile_context>
chip_gen: v6e
topology: v6e:2x2x1
jax: 0.10.0
libtpu: 0.0.40
codegen_flags: <defaults>
</compile_context>

<pallas_src>
import jax
import jax.numpy as jnp
from jax.experimental import pallas as pl
from jax.experimental.pallas import tpu as pltpu


def _round_up(x, m):
    return ((x + m - 1) // m) * m


def _matmul_bias_kernel(x_ref, w_ref, b_ref, o_ref):
    """One (tm, tn) output tile; grid axis 2 reduces over K."""
    k = pl.program_id(2)

    @pl.when(k == 0)
    def _():
        # Initialize the resident output block with the (broadcast) bias.
        o_ref[...] = jnp.broadcast_to(b_ref[...], o_ref.shape).astype(o_ref.dtype)

    # (tm, tk) @ (tk, tn) partial product, f32 accumulation on the MXU.
    o_ref[...] += jnp.dot(x_ref[...], w_ref[...],
                          preferred_element_type=jnp.float32)


def prepare_blank_linear_params(w_frozen, b_frozen, w_blank, b_blank, blank_id):
    """One-time parameter prep (weights are frozen).

    Returns (w_t, b2):
      w_t: (K, N) = W_f^T with column `blank_id` replaced by w_blank.
      b2 : (1, N) = b_f with element `blank_id` replaced by b_blank.
    """
    w_t = jnp.asarray(w_frozen, jnp.float32).T            # (K, N)
    w_t = w_t.at[:, blank_id].set(jnp.asarray(w_blank, jnp.float32))
    b = jnp.asarray(b_frozen, jnp.float32)
    b = b.at[blank_id].set(jnp.asarray(b_blank, jnp.float32))
    return w_t, b.reshape(1, -1)


def learnable_blank_linear(x, w_t, b2, *, tm=256, tn=512, tk=1024):
    """x: (B, T, K) f32.  w_t: (K, N) prepared weight.  b2: (1, N).

    Returns (B, T, N) f32.
    """
    B, T, K = x.shape
    Kw, N = w_t.shape
    assert Kw == K
    M = B * T

    x2 = x.reshape(M, K).astype(jnp.float32)

    # Clamp tiles to the (aligned) problem size; keep (8, 128) alignment.
    tm = min(tm, _round_up(M, 8))
    tn = min(tn, _round_up(N, 128))
    tk = min(tk, _round_up(K, 128))

    Mp, Np, Kp = _round_up(M, tm), _round_up(N, tn), _round_up(K, tk)

    # Zero-pad to tile multiples (zeros along K don't change the result;
    # extra rows/cols are sliced off afterwards).
    if (Mp, Kp) != (M, K):
        x2 = jnp.pad(x2, ((0, Mp - M), (0, Kp - K)))
    if (Kp, Np) != (K, N):
        w_t = jnp.pad(w_t, ((0, Kp - K), (0, Np - N)))
    if Np != N:
        b2 = jnp.pad(b2, ((0, 0), (0, Np - N)))

    grid = (Mp // tm, Np // tn, Kp // tk)

    out2 = pl.pallas_call(
        _matmul_bias_kernel,
        out_shape=jax.ShapeDtypeStruct((Mp, Np), jnp.float32),
        grid_spec=pltpu.PrefetchScalarGridSpec(
            num_scalar_prefetch=0,
            grid=grid,
            in_specs=[
                pl.BlockSpec((tm, tk), lambda i, j, k: (i, k)),   # x tile
                pl.BlockSpec((tk, tn), lambda i, j, k: (k, j)),   # W^T tile
                pl.BlockSpec((1, tn), lambda i, j, k: (0, j)),    # bias tile
            ],
            out_specs=pl.BlockSpec((tm, tn), lambda i, j, k: (i, j)),
        ),
        compiler_params=pltpu.CompilerParams(
            dimension_semantics=("parallel", "parallel", "arbitrary"),
            vmem_limit_bytes=64 * 1024 * 1024,
        ),
    )(x2, w_t, b2)

    if (Mp, Np) != (M, N):
        out2 = out2[:M, :N]
    return out2.reshape(B, T, N)


def _reference(x, w_frozen, b_frozen, w_blank, b_blank, blank_id):
    out = jnp.einsum("btk,nk->btn", x, w_frozen) + b_frozen
    blank = jnp.einsum("btk,k->bt", x, w_blank) + b_blank
    return out.at[..., blank_id].set(blank)


if __name__ == "__main__":
    # Small shapes consistent with the module: (batch, seq, in_features) input,
    # frozen_linear: in_features -> out_features (vocab), blank_projection: in -> 1.
    B, T, K, N = 2, 8, 256, 256
    blank_id = 0

    key = jax.random.PRNGKey(0)
    kx, kw, kb, kwb, kbb = jax.random.split(key, 5)
    x = jax.random.normal(kx, (B, T, K), jnp.float32)
    w_frozen = jax.random.normal(kw, (N, K), jnp.float32) * 0.05   # PyTorch (out, in)
    b_frozen = jax.random.normal(kb, (N,), jnp.float32) * 0.05
    w_blank = jax.random.normal(kwb, (K,), jnp.float32) * 0.05     # Linear(in, 1)
    b_blank = jax.random.normal(kbb, (), jnp.float32) * 0.05

    # One-time parameter prep (fold blank projection into the frozen weight).
    w_t, b2 = prepare_blank_linear_params(w_frozen, b_frozen, w_blank, b_blank,
                                          blank_id)

    out = learnable_blank_linear(x, w_t, b2)
    out = jax.block_until_ready(out)

    ref = _reference(x, w_frozen, b_frozen, w_blank, b_blank, blank_id)
    assert out.shape == (B, T, N)
    assert jnp.allclose(out, ref, atol=1e-4, rtol=1e-4), "mismatch vs reference"

    print("KERNEL_OK")
</pallas_src>

<mosaic_0001>
module attributes {stable_mosaic.version = 11 : i64} {
  func.func @_matmul_bias_kernel(%arg0: i32, %arg1: i32, %arg2: i32, %arg3: memref<16x256xf32, #tpu.memory_space<vmem>>, %arg4: memref<256x256xf32, #tpu.memory_space<vmem>>, %arg5: memref<1x256xf32, #tpu.memory_space<vmem>>, %arg6: memref<16x256xf32, #tpu.memory_space<vmem>>) attributes {dimension_semantics = [#tpu.dimension_semantics<parallel>, #tpu.dimension_semantics<parallel>, #tpu.dimension_semantics<arbitrary>], iteration_bounds = array<i64: 1, 1, 1>, scalar_prefetch = 0 : i64, scratch_operands = 0 : i64, tpu.core_type = #tpu.core_type<tc>, window_params = [{transform_indices = @transform_0, window_bounds = array<i64: 16, 256>}, {transform_indices = @transform_1, window_bounds = array<i64: 256, 256>}, {transform_indices = @transform_2, window_bounds = array<i64: 1, 256>}, {transform_indices = @transform_3, window_bounds = array<i64: 16, 256>}]} {
    %c0_i32 = arith.constant 0 : i32
    %0 = arith.cmpi eq, %arg2, %c0_i32 : i32
    %1 = arith.extui %0 : i1 to i32
    %c0_i32_0 = arith.constant 0 : i32
    %2 = arith.cmpi ne, %1, %c0_i32_0 : i32
    scf.if %2 {
      %c0_8 = arith.constant 0 : index
      %c0_9 = arith.constant 0 : index
      %9 = vector.load %arg5[%c0_8, %c0_9] : memref<1x256xf32, #tpu.memory_space<vmem>>, vector<1x256xf32>
      %10 = vector.shape_cast %9 : vector<1x256xf32> to vector<1x256xf32>
      %11 = vector.broadcast %10 : vector<1x256xf32> to vector<16x256xf32>
      %c0_10 = arith.constant 0 : index
      %c0_11 = arith.constant 0 : index
      %12 = vector.load %arg6[%c0_10, %c0_11] : memref<16x256xf32, #tpu.memory_space<vmem>>, vector<16x256xf32>
      tpu.vector_store %arg6[%c0_10, %c0_11], %11 {strides = array<i32>} : memref<16x256xf32, #tpu.memory_space<vmem>>, vector<16x256xf32>,
    } else {
    }
    %c0 = arith.constant 0 : index
    %c0_1 = arith.constant 0 : index
    %3 = vector.load %arg6[%c0, %c0_1] : memref<16x256xf32, #tpu.memory_space<vmem>>, vector<16x256xf32>
    %c0_2 = arith.constant 0 : index
    %c0_3 = arith.constant 0 : index
    %4 = vector.load %arg3[%c0_2, %c0_3] : memref<16x256xf32, #tpu.memory_space<vmem>>, vector<16x256xf32>
    %c0_4 = arith.constant 0 : index
    %c0_5 = arith.constant 0 : index
    %5 = vector.load %arg4[%c0_4, %c0_5] : memref<256x256xf32, #tpu.memory_space<vmem>>, vector<256x256xf32>
    %cst = arith.constant dense<0.000000e+00> : vector<16x256xf32>
    %6 = tpu.matmul %4, %5, %cst {dimension_numbers = #tpu.dot_dimension_numbers<[1], [0], [0], [1], [0, 0, 1, 1], [], []>} : vector<16x256xf32>, vector<256x256xf32>, vector<16x256xf32> -> vector<16x256xf32>
    %7 = arith.addf %3, %6 : vector<16x256xf32>
    %c0_6 = arith.constant 0 : index
    %c0_7 = arith.constant 0 : index
    %8 = vector.load %arg6[%c0_6, %c0_7] : memref<16x256xf32, #tpu.memory_space<vmem>>, vector<16x256xf32>
    tpu.vector_store %arg6[%c0_6, %c0_7], %7 {strides = array<i32>} : memref<16x256xf32, #tpu.memory_space<vmem>>, vector<16x256xf32>,
    return
  }
  func.func @transform_0(%arg0: i32, %arg1: i32, %arg2: i32) -> (i32, i32) {
    %c0_i32 = arith.constant 0 : i32
    return %arg0, %arg2 : i32, i32
  }
  func.func @transform_1(%arg0: i32, %arg1: i32, %arg2: i32) -> (i32, i32) {
    %c0_i32 = arith.constant 0 : i32
    return %arg2, %arg1 : i32, i32
  }
  func.func @transform_2(%arg0: i32, %arg1: i32, %arg2: i32) -> (i32, i32) {
    %c0_i32 = arith.constant 0 : i32
    %c0_i32_0 = arith.constant 0 : i32
    return %c0_i32, %arg1 : i32, i32
  }
  func.func @transform_3(%arg0: i32, %arg1: i32, %arg2: i32) -> (i32, i32) {
    %c0_i32 = arith.constant 0 : i32
    return %arg0, %arg1 : i32, i32
  }
}

</mosaic_0001>

<bundles_post_ra>
// kernel: tpu_custom_call.1
= control target key start
LH: loop header
LB: loop body
LE: loop exit
PB: predicated region body
PF: predicated region fallthrough
CT: control target
= control target key end

     0   :  { %8 = vsyncpa [#allocation3], 0  ;;  %s419_s0 = inlined_call_operand.hbm [shape: f32[16,256], index: 0, kind: input, shape index: {}]   ;;  %s420_s1 = inlined_call_operand.hbm [shape: f32[256,256], index: 1, kind: input, shape index: {}]   ;;  %s421_s2 = inlined_call_operand.vmem [shape: f32[1,256], index: 2, kind: input, shape index: {}]   ;;  %s422_s3 = inlined_call_operand.hbm [shape: f32[16,256], index: 3, kind: output, shape index: {}]  }
   0x1   :  { %9 = vsyncpa [#allocation6], 0 }
   0x2   :  { %10 = vsyncpa [#allocation4], 0  ;;  %s373_s12 = smov [#allocation2]  }
   0x3   :  { %s16_s13 = sshll.u32 %s373_s12, 4  ;;  %s17_s13 = int_to_ptr.vmem [resolvable:$true] %s16_s13 }
   0x4   :  { %s315_s14 = scalar_lea.vmem %s17_s13, 512  ;;  %p320_p1 = scmp.lt.s32.totalorder %s17_s13, %s17_s13 }
   0x5   :  { %p316_p0 = scmp.ne.s32.totalorder %s17_s13, %s315_s14  ;;  %p321_p2 = scmp.lt.s32.totalorder %s315_s14, %s315_s14 }
   0x7   :  { %p322_p3 = por %p321_p2, %p320_p1 }
   0x9   :  { %p323_p4 = pnand %p322_p3, %p316_p0 }
   0xb   :  { %326 = shalt.err (!%p323_p4)
}
   0xc   :  { %s374_s15 = smov 256   ;;  %s375_s16 = smov 16  }
   0xd   :  { %22 = dma.hbm_to_vmem [thread:$0]  %s419_s0, 512, %s17_s13, [#allocation3], %s374_s15, %s374_s15, %s375_s16  }
   0xe   :  { %s376_s19 = smov [#allocation5]  }
   0xf   :  { %s28_s20 = sshll.u32 %s376_s19, 4  ;;  %s29_s20 = int_to_ptr.vmem [resolvable:$true] %s28_s20 }
  0x10   :  { %s335_s21 = scalar_lea.vmem %s29_s20, 8192  ;;  %p340_p6 = scmp.lt.s32.totalorder %s29_s20, %s29_s20 }
  0x11   :  { %p336_p5 = scmp.ne.s32.totalorder %s29_s20, %s335_s21  ;;  %p341_p7 = scmp.lt.s32.totalorder %s335_s21, %s335_s21 }
  0x13   :  { %p342_p8 = por %p341_p7, %p340_p6 }
  0x15   :  { %p343_p9 = pnand %p342_p8, %p336_p5 }
  0x17   :  { %346 = shalt.err (!%p343_p9)
}
  0x18   :  { %34 = dma.hbm_to_vmem [thread:$0]  %s420_s1, 8192, %s29_s20, [#allocation6], %s374_s15, %s374_s15, %s375_s16  }
  0x19   :  { %367 = dma.done.wait [#allocation3], 512  }
  0x1a   :  { %368 = vsyncadd [#allocation3], 4294966784 }
  0x1b   :  { %369 = dma.done.wait [#allocation6], 8192  }
  0x1c   :  { %370 = vsyncadd [#allocation6], 4294959104  ;;  %v102_v0 = vld [vmem:[#allocation5 + $0xf8] sm:$0xff]  ;;  %v101_v1 = vld [vmem:[#allocation5 + $0xf0] sm:$0xff]  ;;  %s377_s24 = smov [#allocation7]  }
  0x1d   :  { %v100_v2 = vld [vmem:[#allocation5 + $0xe8] sm:$0xff]  ;;  %135 = vmatprep.subr.mxu0 %v102_v0  ;;  %238 = vmatprep.subr.mxu1 %v102_v0  ;;  %v99_v3 = vld [vmem:[#allocation5 + $0xe0] sm:$0xff]  ;;  %v98_v4 = vld [vmem:[#allocation5 + $0xd8] sm:$0xff]  ;;  %s225_s25 = sshll.u32 %s377_s24, 4  ;;  %s226_s25 = int_to_ptr.vmem [resolvable:$true] %s225_s25 }
  0x1e   :  { %136 = vmatpush1.msra.mxu0 %v101_v1  ;;  %270 = vmatpush1.msra.mxu1 %v101_v1  ;;  %v97_v5 = vld [vmem:[#allocation5 + $0xd0] sm:$0xff]  ;;  %v96_v6 = vld [vmem:[#allocation5 + $0xc8] sm:$0xff]  ;;  %v95_v7 = vld [vmem:[#allocation5 + $0xc0] sm:$0xff]  ;;  %s347_s26 = scalar_lea.vmem %s226_s25, 512  ;;  %p352_p11 = scmp.lt.s32.totalorder %s226_s25, %s226_s25 }
  0x1f   :  { %137 = vmatprep.subr.mxu0 %v100_v2  ;;  %239 = vmatprep.subr.mxu1 %v100_v2  ;;  %v94_v8 = vld [vmem:[#allocation5 + $0xb8] sm:$0xff]  ;;  %v93_v9 = vld [vmem:[#allocation5 + $0xb0] sm:$0xff]  ;;  %v92_v10 = vld [vmem:[#allocation5 + $0xa8] sm:$0xff]  ;;  %p348_p10 = scmp.ne.s32.totalorder %s226_s25, %s347_s26  ;;  %p353_p12 = scmp.lt.s32.totalorder %s347_s26, %s347_s26 }
  0x20   :  { %138 = vmatpush1.msra.mxu0 %v99_v3  ;;  %271 = vmatpush1.msra.mxu1 %v99_v3  ;;  %v91_v11 = vld [vmem:[#allocation5 + $0xa0] sm:$0xff]  ;;  %v90_v12 = vld [vmem:[#allocation5 + $0x98] sm:$0xff]  ;;  %v89_v13 = vld [vmem:[#allocation5 + $0x90] sm:$0xff] }
  0x21   :  { %139 = vmatprep.subr.mxu0 %v98_v4  ;;  %240 = vmatprep.subr.mxu1 %v98_v4  ;;  %v88_v14 = vld [vmem:[#allocation5 + $0x88] sm:$0xff]  ;;  %v87_v15 = vld [vmem:[#allocation5 + $0x80] sm:$0xff]  ;;  %v86_v16 = vld [vmem:[#allocation5 + $0x78] sm:$0xff]  ;;  %v49_v4 = vlaneseq  ;;  %p354_p13 = por %p353_p12, %p352_p11 }
  0x22   :  { %140 = vmatpush1.msra.mxu0 %v97_v5  ;;  %272 = vmatpush1.msra.mxu1 %v97_v5  ;;  %v85_v17 = vld [vmem:[#allocation5 + $0x70] sm:$0xff]  ;;  %v84_v18 = vld [vmem:[#allocation5 + $0x68] sm:$0xff]  ;;  %v83_v19 = vld [vmem:[#allocation5 + $0x60] sm:$0xff] }
  0x23   :  { %141 = vmatprep.subr.mxu0 %v96_v6  ;;  %241 = vmatprep.subr.mxu1 %v96_v6  ;;  %v82_v20 = vld [vmem:[#allocation5 + $0x58] sm:$0xff]  ;;  %v81_v21 = vld [vmem:[#allocation5 + $0x50] sm:$0xff]  ;;  %v80_v22 = vld [vmem:[#allocation5 + $0x48] sm:$0xff]  ;;  %v50_v5 = vshrl.u32 %v49_v4, 7  ;;  %p355_p0 = pnand %p354_p13, %p348_p10 }
  0x24   :  { %142 = vmatpush1.msra.mxu0 %v95_v7  ;;  %273 = vmatpush1.msra.mxu1 %v95_v7  ;;  %v79_v23 = vld [vmem:[#allocation5 + $0x40] sm:$0xff]  ;;  %v78_v24 = vld [vmem:[#allocation5 + $0x38] sm:$0xff]  ;;  %v77_v25 = vld [vmem:[#allocation5 + $0x30] sm:$0xff] }
  0x25   :  { %143 = vmatprep.subr.mxu0 %v94_v8  ;;  %242 = vmatprep.subr.mxu1 %v94_v8  ;;  %v76_v26 = vld [vmem:[#allocation5 + $0x28] sm:$0xff]  ;;  %v75_v27 = vld [vmem:[#allocation5 + $0x20] sm:$0xff]  ;;  %v74_v28 = vld [vmem:[#allocation5 + $0x18] sm:$0xff]  ;;  %v51_v6 = vsub.s32 0, %v50_v5  ;;  %v55_v8 = vsub.s32 1, %v50_v5 }
  0x26   :  { %144 = vmatpush1.msra.mxu0 %v93_v9  ;;  %274 = vmatpush1.msra.mxu1 %v93_v9  ;;  %v73_v29 = vld [vmem:[#allocation5 + $0x10] sm:$0xff]  ;;  %v72_v30 = vld [vmem:[#allocation5 + $0x8] sm:$0xff]  ;;  %v71_v31 = vld [vmem:[#allocation5] sm:$0xff] }
  0x27   :  { %145 = vmatprep.subr.mxu0 %v92_v10  ;;  %243 = vmatprep.subr.mxu1 %v92_v10  ;;  %v134_v32 = vld [vmem:[#allocation5 + $0x1f8] sm:$0xff]  ;;  %v133_v33 = vld [vmem:[#allocation5 + $0x1f0] sm:$0xff]  ;;  %v132_v34 = vld [vmem:[#allocation5 + $0x1e8] sm:$0xff] }
  0x28   :  { %146 = vmatpush1.msra.mxu0 %v91_v11  ;;  %275 = vmatpush1.msra.mxu1 %v91_v11  ;;  %v131_v35 = vld [vmem:[#allocation5 + $0x1e0] sm:$0xff]  ;;  %v130_v36 = vld [vmem:[#allocation5 + $0x1d8] sm:$0xff]  ;;  %v129_v37 = vld [vmem:[#allocation5 + $0x1d0] sm:$0xff] }
  0x29   :  { %147 = vmatprep.subr.mxu0 %v90_v12  ;;  %244 = vmatprep.subr.mxu1 %v90_v12  ;;  %v128_v38 = vld [vmem:[#allocation5 + $0x1c8] sm:$0xff]  ;;  %v127_v39 = vld [vmem:[#allocation5 + $0x1c0] sm:$0xff]  ;;  %v126_v40 = vld [vmem:[#allocation5 + $0x1b8] sm:$0xff] }
  0x2a   :  { %148 = vmatpush1.msra.mxu0 %v89_v13  ;;  %276 = vmatpush1.msra.mxu1 %v89_v13  ;;  %v125_v41 = vld [vmem:[#allocation5 + $0x1b0] sm:$0xff]  ;;  %v124_v42 = vld [vmem:[#allocation5 + $0x1a8] sm:$0xff]  ;;  %v123_v43 = vld [vmem:[#allocation5 + $0x1a0] sm:$0xff] }
  0x2b   :  { %149 = vmatprep.subr.mxu0 %v88_v14  ;;  %245 = vmatprep.subr.mxu1 %v88_v14  ;;  %v122_v44 = vld [vmem:[#allocation5 + $0x198] sm:$0xff]  ;;  %v121_v45 = vld [vmem:[#allocation5 + $0x190] sm:$0xff]  ;;  %v120_v46 = vld [vmem:[#allocation5 + $0x188] sm:$0xff] }
  0x2c   :  { %150 = vmatpush1.msra.mxu0 %v87_v15  ;;  %277 = vmatpush1.msra.mxu1 %v87_v15  ;;  %v119_v47 = vld [vmem:[#allocation5 + $0x180] sm:$0xff]  ;;  %v118_v48 = vld [vmem:[#allocation5 + $0x178] sm:$0xff]  ;;  %v117_v49 = vld [vmem:[#allocation5 + $0x170] sm:$0xff] }
  0x2d   :  { %151 = vmatprep.subr.mxu0 %v86_v16  ;;  %246 = vmatprep.subr.mxu1 %v86_v16  ;;  %v116_v50 = vld [vmem:[#allocation5 + $0x168] sm:$0xff]  ;;  %v115_v51 = vld [vmem:[#allocation5 + $0x160] sm:$0xff]  ;;  %v114_v52 = vld [vmem:[#allocation5 + $0x158] sm:$0xff] }
  0x2e   :  { %152 = vmatpush1.msra.mxu0 %v85_v17  ;;  %278 = vmatpush1.msra.mxu1 %v85_v17  ;;  %v113_v53 = vld [vmem:[#allocation5 + $0x150] sm:$0xff]  ;;  %v112_v54 = vld [vmem:[#allocation5 + $0x148] sm:$0xff]  ;;  %v111_v55 = vld [vmem:[#allocation5 + $0x140] sm:$0xff] }
  0x2f   :  { %153 = vmatprep.subr.mxu0 %v84_v18  ;;  %247 = vmatprep.subr.mxu1 %v84_v18  ;;  %v110_v56 = vld [vmem:[#allocation5 + $0x138] sm:$0xff]  ;;  %v109_v57 = vld [vmem:[#allocation5 + $0x130] sm:$0xff]  ;;  %v108_v58 = vld [vmem:[#allocation5 + $0x128] sm:$0xff] }
  0x30   :  { %154 = vmatpush1.msra.mxu0 %v83_v19  ;;  %279 = vmatpush1.msra.mxu1 %v83_v19  ;;  %v107_v59 = vld [vmem:[#allocation5 + $0x120] sm:$0xff]  ;;  %v106_v60 = vld [vmem:[#allocation5 + $0x118] sm:$0xff]  ;;  %v105_v61 = vld [vmem:[#allocation5 + $0x110] sm:$0xff] }
  0x31   :  { %155 = vmatprep.subr.mxu0 %v82_v20  ;;  %248 = vmatprep.subr.mxu1 %v82_v20  ;;  %v104_v62 = vld [vmem:[#allocation5 + $0x108] sm:$0xff]  ;;  %v103_v63 = vld [vmem:[#allocation5 + $0x100] sm:$0xff]  ;;  %v70_v1 = vld [vmem:[#allocation2 + $0x18] sm:$0xff] }
  0x32   :  { %156 = vmatpush1.msra.mxu0 %v81_v21  ;;  %280 = vmatpush1.msra.mxu1 %v81_v21  ;;  %v68_v0 = vld [vmem:[#allocation2 + $0x8] sm:$0xff]  ;;  %v67_v2 = vld [vmem:[#allocation2] sm:$0xff]  ;;  %v69_v3 = vld [vmem:[#allocation2 + $0x10] sm:$0xff] }
  0x33   :  { %157 = vmatprep.subr.mxu0 %v80_v22  ;;  %249 = vmatprep.subr.mxu1 %v80_v22  ;;  %v47_v7 = vld [vmem:[%s421_s2] sm:$0x3] }
  0x34   :  { %158 = vmatpush1.msra.mxu0 %v79_v23  ;;  %281 = vmatpush1.msra.mxu1 %v79_v23  ;;  %v52_v9 = vrot.slane %v47_v7, %v51_v6  ;;  %v56_v10 = vrot.slane %v47_v7, %v55_v8 }
  0x35   :  { %159 = vmatprep.subr.mxu0 %v78_v24  ;;  %250 = vmatprep.subr.mxu1 %v78_v24 }
  0x36   :  { %160 = vmatpush1.msra.mxu0 %v77_v25  ;;  %282 = vmatpush1.msra.mxu1 %v77_v25 }
  0x37   :  { %161 = vmatprep.subr.mxu0 %v76_v26  ;;  %251 = vmatprep.subr.mxu1 %v76_v26 }
  0x38   :  { %162 = vmatpush1.msra.mxu0 %v75_v27  ;;  %283 = vmatpush1.msra.mxu1 %v75_v27 }
  0x39   :  { %163 = vmatprep.subr.mxu0 %v74_v28  ;;  %252 = vmatprep.subr.mxu1 %v74_v28 }
  0x3a   :  { %164 = vmatpush1.msra.mxu0 %v73_v29  ;;  %284 = vmatpush1.msra.mxu1 %v73_v29 }
  0x3b   :  { %165 = vmatprep.subr.mxu0 %v72_v30  ;;  %253 = vmatprep.subr.mxu1 %v72_v30 }
  0x3c   :  { %166 = vmatpush1.msra.mxu0 %v71_v31  ;;  %285 = vmatpush1.msra.mxu1 %v71_v31 }
  0x3d   :  { %167 = vmatprep.subr.mxu0 %v134_v32  ;;  %254 = vmatprep.subr.mxu1 %v134_v32 }
  0x3e   :  { %168 = vmatpush2.msra.mxu0 %v133_v33  ;;  %286 = vmatpush2.msra.mxu1 %v133_v33 }
  0x3f   :  { %169 = vmatprep.subr.mxu0 %v132_v34  ;;  %255 = vmatprep.subr.mxu1 %v132_v34 }
  0x40   :  { %170 = vmatpush2.msra.mxu0 %v131_v35  ;;  %287 = vmatpush2.msra.mxu1 %v131_v35 }
  0x41   :  { %171 = vmatprep.subr.mxu0 %v130_v36  ;;  %256 = vmatprep.subr.mxu1 %v130_v36 }
  0x42   :  { %172 = vmatpush2.msra.mxu0 %v129_v37  ;;  %288 = vmatpush2.msra.mxu1 %v129_v37 }
  0x43   :  { %173 = vmatprep.subr.mxu0 %v128_v38  ;;  %257 = vmatprep.subr.mxu1 %v128_v38 }
  0x44   :  { %174 = vmatpush2.msra.mxu0 %v127_v39  ;;  %289 = vmatpush2.msra.mxu1 %v127_v39 }
  0x45   :  { %175 = vmatprep.subr.mxu0 %v126_v40  ;;  %258 = vmatprep.subr.mxu1 %v126_v40 }
  0x46   :  { %176 = vmatpush2.msra.mxu0 %v125_v41  ;;  %290 = vmatpush2.msra.mxu1 %v125_v41 }
  0x47   :  { %177 = vmatprep.subr.mxu0 %v124_v42  ;;  %259 = vmatprep.subr.mxu1 %v124_v42 }
  0x48   :  { %178 = vmatpush2.msra.mxu0 %v123_v43  ;;  %291 = vmatpush2.msra.mxu1 %v123_v43 }
  0x49   :  { %179 = vmatprep.subr.mxu0 %v122_v44  ;;  %260 = vmatprep.subr.mxu1 %v122_v44 }
  0x4a   :  { %180 = vmatpush2.msra.mxu0 %v121_v45  ;;  %292 = vmatpush2.msra.mxu1 %v121_v45 }
  0x4b   :  { %181 = vmatprep.subr.mxu0 %v120_v46  ;;  %261 = vmatprep.subr.mxu1 %v120_v46 }
  0x4c   :  { %182 = vmatpush2.msra.mxu0 %v119_v47  ;;  %293 = vmatpush2.msra.mxu1 %v119_v47 }
  0x4d   :  { %183 = vmatprep.subr.mxu0 %v118_v48  ;;  %262 = vmatprep.subr.mxu1 %v118_v48 }
  0x4e   :  { %184 = vmatpush2.msra.mxu0 %v117_v49  ;;  %294 = vmatpush2.msra.mxu1 %v117_v49 }
  0x4f   :  { %185 = vmatprep.subr.mxu0 %v116_v50  ;;  %263 = vmatprep.subr.mxu1 %v116_v50 }
  0x50   :  { %186 = vmatpush2.msra.mxu0 %v115_v51  ;;  %295 = vmatpush2.msra.mxu1 %v115_v51 }
  0x51   :  { %187 = vmatprep.subr.mxu0 %v114_v52  ;;  %264 = vmatprep.subr.mxu1 %v114_v52 }
  0x52   :  { %188 = vmatpush2.msra.mxu0 %v113_v53  ;;  %296 = vmatpush2.msra.mxu1 %v113_v53 }
  0x53   :  { %189 = vmatprep.subr.mxu0 %v112_v54  ;;  %265 = vmatprep.subr.mxu1 %v112_v54 }
  0x54   :  { %190 = vmatpush2.msra.mxu0 %v111_v55  ;;  %297 = vmatpush2.msra.mxu1 %v111_v55 }
  0x55   :  { %191 = vmatprep.subr.mxu0 %v110_v56  ;;  %266 = vmatprep.subr.mxu1 %v110_v56 }
  0x56   :  { %192 = vmatpush2.msra.mxu0 %v109_v57  ;;  %298 = vmatpush2.msra.mxu1 %v109_v57 }
  0x57   :  { %193 = vmatprep.subr.mxu0 %v108_v58  ;;  %267 = vmatprep.subr.mxu1 %v108_v58 }
  0x58   :  { %194 = vmatpush2.msra.mxu0 %v107_v59  ;;  %299 = vmatpush2.msra.mxu1 %v107_v59 }
  0x59   :  { %195 = vmatprep.subr.mxu0 %v106_v60  ;;  %268 = vmatprep.subr.mxu1 %v106_v60 }
  0x5a   :  { %196 = vmatpush2.msra.mxu0 %v105_v61  ;;  %300 = vmatpush2.msra.mxu1 %v105_v61 }
  0x5b   :  { %197 = vmatprep.subr.mxu0 %v104_v62  ;;  %269 = vmatprep.subr.mxu1 %v104_v62 }
  0x5c   :  { %198 = vmatpush2.msra.mxu0 %v103_v63  ;;  %301 = vmatpush2.msra.mxu1 %v103_v63 }
  0x5d   :  { %199 = vmatprep.mubr.f32.mxu0 %v68_v0  ;;  %205 = vmatprep.mubr.f32.mxu1 %v70_v1 }
  0x5e   :  { %200 = vmatmul.mubr.f32.vlgmr.msra.gmra.mxu0 %v67_v2  ;;  %206 = vmatmul.mubr.f32.vlgmr.msra.gmra.mxu1 %v69_v3 }
 0x11e   :  { %v201_v11 = vpop.f32.mrf.mxu0  ;;  %v207_v12 = vpop.f32.mrf.mxu1 }
 0x11f   :  { %v212_v13 = vadd.f32 %v201_v11, %v52_v9  ;;  %v214_v14 = vadd.f32 %v207_v12, %v52_v9 }
 0x120   :  { %v203_v15 = vpop.f32.mrf.mxu0  ;;  %v209_v16 = vpop.f32.mrf.mxu1 }
 0x121   :  { %216 = vst [vmem:[#allocation7] sm:$0xff] %v212_v13  ;;  %218 = vst [vmem:[#allocation7 + $0x10] sm:$0xff] %v214_v14  ;;  %v213_v17 = vadd.f32 %v203_v15, %v56_v10  ;;  %v215_v18 = vadd.f32 %v209_v16, %v56_v10 }
 0x123   :  { %217 = vst [vmem:[#allocation7 + $0x8] sm:$0xff] %v213_v17  ;;  %219 = vst [vmem:[#allocation7 + $0x18] sm:$0xff] %v215_v18 }
 0x124   :  { %358 = shalt.err (!%p355_p0)
}
 0x125   :  { %231 = dma.vmem_to_hbm [thread:$0]  %s226_s25, 512, %s422_s3, [#allocation4], %s374_s15, %s374_s15, %s375_s16  }
 0x126   :  { %371 = dma.done.wait [#allocation4], 512  }
 0x127   :  { %372 = vsyncadd [#allocation4], 4294966784 }
 0x128   :  { %235 = vsyncpa [#allocation3], 1 }
 0x129   :  { %236 = vsyncpa [#allocation6], 1 }
 0x12a   :  { %237 = vsyncpa [#allocation4], 1 }

</bundles_post_ra>
